<compile_context>
chip_gen: v7x
topology: tpu7x:2x2x1
jax: 0.10.0
libtpu: 0.0.40
codegen_flags: <defaults>
</compile_context>

<pallas_src>
import functools

import jax
import jax.numpy as jnp
from jax.experimental import pallas as pl
from jax.experimental.pallas import tpu as pltpu


def _round_up(x: int, m: int) -> int:
    return (x + m - 1) // m * m


def _vmem_capacity_bytes() -> int:
    try:
        cap = int(getattr(pltpu.get_tpu_info(), "vmem_capacity_bytes", 0))
        if cap > 0:
            return cap
    except Exception:
        pass
    return 64 * 1024 * 1024  # conservative fallback (safe even on v7x)


def _vmem_budget_bytes(cap: int) -> int:
    # Leave headroom for compiler-internal scratch (never request full VMEM).
    return max(cap - max(cap // 8, 8 * 1024 * 1024), 16 * 1024 * 1024)


def _choose_f_tiling(F: int, target: int, split: int):
    """Pick a lane-aligned FFN tile tf and padded extent F_pad (F_pad % (tf*split) == 0)."""
    if split == 1 and F <= target:
        return F, F                                   # single full stripe
    t = max(128, (max(target, 128) // 128) * 128)
    while t >= 128:                                   # prefer an exact divisor (no padding)
        if F % (t * split) == 0:
            return t, F
        t -= 128
    tf = max(128, (max(target, 128) // 128) * 128)
    tf = min(tf, max(128, (_round_up(F, 128 * split) // (128 * split)) * 128))
    return tf, _round_up(F, tf * split)


def _glu_partial(x, w1t, v1t, w2):
    # x: (tn, H); w1t/v1t: (H, tf); w2: (tf, H).  All NN gemms on the MXU.
    x1 = jnp.dot(x, w1t, preferred_element_type=jnp.float32)   # (tn, tf)
    x2 = jnp.dot(x, v1t, preferred_element_type=jnp.float32)   # (tn, tf)
    h = (x1 * jax.nn.sigmoid(x1)) * x2                          # SiLU gate, f32 (EUP)
    return jnp.dot(h.astype(w2.dtype), w2,
                   preferred_element_type=jnp.float32)          # (tn, H)


def _kernel_acc_in_output(eidx_ref, x_ref, w1t_ref, v1t_ref, w2_ref, o_ref):
    # Output dtype is f32 and the block is resident across the F axis:
    # accumulate directly into it (no scratch).
    f = pl.program_id(2)

    @pl.when(f == 0)
    def _():
        o_ref[...] = jnp.zeros_like(o_ref)

    o_ref[...] += _glu_partial(x_ref[...], w1t_ref[0], v1t_ref[0], w2_ref[0])[None]


def _kernel_acc_in_scratch(eidx_ref, x_ref, w1t_ref, v1t_ref, w2_ref, o_ref,
                           acc_ref):
    f = pl.program_id(2)

    @pl.when(f == 0)
    def _():
        acc_ref[...] = jnp.zeros_like(acc_ref)

    acc_ref[...] += _glu_partial(x_ref[...], w1t_ref[0], v1t_ref[0], w2_ref[0])

    @pl.when(f == pl.num_programs(2) - 1)
    def _():
        o_ref[...] = acc_ref[...].astype(o_ref.dtype)[None]


def prepare_expert_weights(w1, v1, w2, *, dtype=None):
    """One-time relayout: w1/v1 (E, F, H) -> (E, H, F) so the kernel's input
    projections are plain NN gemms.  Optionally cast weights (e.g. to bf16)."""
    if dtype is not None:
        w1, v1, w2 = (a.astype(dtype) for a in (w1, v1, w2))
    return jnp.swapaxes(w1, 1, 2), jnp.swapaxes(v1, 1, 2), w2


@functools.partial(
    jax.jit,
    static_argnames=("tile_n", "tile_f", "num_core_splits", "weight_buffers"))
def dbrx_expert_glu(x, w1t, v1t, w2, expert_idx, *, tile_n=None, tile_f=None,
                    num_core_splits=1, weight_buffers=2):
    """Fused DBRX expert GLU.

    x: (B, T, H); w1t/v1t: (E, H, F) from prepare_expert_weights; w2: (E, F, H);
    expert_idx: int scalar.

    Auto config (tile_n=None / tile_f=None): derived from the device's VMEM
    capacity.  tile_n is the roofline knob (~2*tile_n flops per weight byte);
    tile_f only sets per-step VMEM.  num_core_splits=2 splits the F stripes
    across the two TensorCores (v7x megacore) for decode-shaped calls; partial
    results are summed outside the kernel.  weight_buffers=3 (v5e) requests a
    third weight buffer to hide HBM jitter.
    """
    B, T, H = x.shape
    E, H2, F = w1t.shape
    assert H2 == H and v1t.shape == (E, H, F) and w2.shape == (E, F, H)
    N = B * T
    split = int(num_core_splits)
    assert split >= 1

    w_dtype = w1t.dtype
    out_dtype = jnp.dtype(x.dtype)
    wbytes = jnp.dtype(w_dtype).itemsize
    xbytes = wbytes                      # x is cast to the weight dtype below
    obytes = out_dtype.itemsize
    acc_in_output = out_dtype == jnp.float32
    acc_bytes = 0 if acc_in_output else 4

    cap = _vmem_capacity_bytes()
    vmem_budget = _vmem_budget_bytes(cap)

    if tile_f is None:
        tile_f = 256 if cap <= 64 * 1024 * 1024 else 512
    tf, F_pad = _choose_f_tiling(F, int(tile_f), split)
    f_tiles_per_split = F_pad // (tf * split)

    # Token tile: largest that fits the remaining VMEM budget.
    n8 = _round_up(N, 8)
    if tile_n is not None:
        tn = max(8, (min(int(tile_n), n8) // 8) * 8)
    else:
        weight_bytes = 3 * int(weight_buffers) * tf * H * wbytes
        per_row = H * (2 * xbytes + 2 * obytes + acc_bytes)
        avail = max(vmem_budget - weight_bytes - (4 << 20), 8 * per_row)
        tn = min(avail // per_row, 1024)
        if tn >= n8:
            tn = n8
        elif tn >= 256:
            tn = (tn // 256) * 256
        elif tn >= 128:
            tn = 128
        else:
            tn = max((tn // 8) * 8, 8)
    n_pad = _round_up(N, tn)
    n_tiles = n_pad // tn

    # Host-side prep: flatten tokens, cast ONCE to the weight dtype, pad.
    x2d = x.reshape(N, H).astype(w_dtype)
    if n_pad != N:
        x2d = jnp.pad(x2d, ((0, n_pad - N), (0, 0)))
    if F_pad != F:
        pf = F_pad - F                   # zero-padding F is exact (contributes 0)
        w1t = jnp.pad(w1t, ((0, 0), (0, 0), (0, pf)))
        v1t = jnp.pad(v1t, ((0, 0), (0, 0), (0, pf)))
        w2 = jnp.pad(w2, ((0, 0), (0, pf), (0, 0)))

    eidx = jnp.asarray(expert_idx, dtype=jnp.int32).reshape((1,))

    grid = (split, n_tiles, f_tiles_per_split)

    def _wspec(shape, index_map):
        if int(weight_buffers) == 2:
            return pl.BlockSpec(shape, index_map)
        return pl.BlockSpec(shape, index_map,
                            pipeline_mode=pl.Buffered(int(weight_buffers)))

    in_specs = [
        pl.BlockSpec((tn, H), lambda c, i, f, e: (i, 0)),    # x: resident over F
        _wspec((1, H, tf),
               lambda c, i, f, e: (e[0], 0, c * f_tiles_per_split + f)),   # w1t
        _wspec((1, H, tf),
               lambda c, i, f, e: (e[0], 0, c * f_tiles_per_split + f)),   # v1t
        _wspec((1, tf, H),
               lambda c, i, f, e: (e[0], c * f_tiles_per_split + f, 0)),   # w2
    ]
    out_spec = pl.BlockSpec((1, tn, H), lambda c, i, f, e: (c, i, 0))

    if acc_in_output:
        kernel = _kernel_acc_in_output
        scratch = []
    else:
        kernel = _kernel_acc_in_scratch
        scratch = [pltpu.VMEM((tn, H), jnp.float32)]

    cost = pl.CostEstimate(
        flops=6 * n_pad * F_pad * H,
        transcendentals=n_pad * F_pad,
        bytes_accessed=(n_tiles * 3 * F_pad * H * wbytes   # weights, per N tile
                        + split * n_pad * H * xbytes       # x, per core split
                        + split * n_pad * H * obytes),     # output writeback
    )

    out3 = pl.pallas_call(
        kernel,
        out_shape=jax.ShapeDtypeStruct((split, n_pad, H), out_dtype),
        grid_spec=pltpu.PrefetchScalarGridSpec(
            num_scalar_prefetch=1,
            grid=grid,
            in_specs=in_specs,
            out_specs=out_spec,
            scratch_shapes=scratch,
        ),
        compiler_params=pltpu.CompilerParams(
            dimension_semantics=("parallel", "parallel", "arbitrary"),
            vmem_limit_bytes=int(vmem_budget),
        ),
        cost_estimate=cost,
    )(eidx, x2d, w1t, v1t, w2)

    out2d = out3[0] if split == 1 else jnp.sum(out3, axis=0)
    return out2d[:N].reshape(B, T, H)


def reference_glu(x, w1, v1, w2, expert_idx):
    we1, ve1, we2 = w1[expert_idx], v1[expert_idx], w2[expert_idx]
    x1 = jnp.einsum("bth,fh->btf", x, we1)
    x2 = jnp.einsum("bth,fh->btf", x, ve1)
    h = jax.nn.silu(x1) * x2
    return jnp.einsum("btf,fh->bth", h, we2)


def _make_params(key, E, F, H, dtype):
    kw1, kv1, kw2 = jax.random.split(key, 3)
    mk = lambda k: (jax.random.normal(k, (E * F, H), dtype=jnp.float32) * 0.02
                    ).astype(dtype).reshape(E, F, H)
    return mk(kw1), mk(kv1), mk(kw2)


if __name__ == "__main__":
    key = jax.random.PRNGKey(0)
    k1, k2, k3, k4 = jax.random.split(key, 4)

    # --- Small, module-consistent shapes (single-tile path, auto config) ---
    B, T, hidden_size, ffn_hidden_size, moe_num_experts = 2, 8, 32, 64, 4
    expert_idx = 2
    x = jax.random.normal(k1, (B, T, hidden_size), dtype=jnp.float32)
    w1, v1, w2 = _make_params(k2, moe_num_experts, ffn_hidden_size,
                              hidden_size, jnp.float32)
    w1t, v1t, w2p = prepare_expert_weights(w1, v1, w2)

    out = dbrx_expert_glu(x, w1t, v1t, w2p, expert_idx)
    out = jax.block_until_ready(out)
    ref = reference_glu(x, w1, v1, w2, expert_idx)
    assert out.shape == (B, T, hidden_size)
    assert jnp.allclose(out, ref, atol=1e-4, rtol=1e-4), "mismatch (small)"

    # --- Shapes forcing a real (N-tiles, F-tiles) reduction grid ---
    B2, T2, H2, F2, E2 = 2, 64, 128, 256, 2
    x_b = jax.random.normal(k3, (B2, T2, H2), dtype=jnp.float32)
    w1b, v1b, w2b = _make_params(k4, E2, F2, H2, jnp.float32)
    w1bt, v1bt, w2bp = prepare_expert_weights(w1b, v1b, w2b)

    out_b = dbrx_expert_glu(x_b, w1bt, v1bt, w2bp, 1, tile_n=64, tile_f=128)
    out_b = jax.block_until_ready(out_b)
    ref_b = reference_glu(x_b, w1b, v1b, w2b, 1)
    assert jnp.allclose(out_b, ref_b, atol=1e-3, rtol=1e-3), "mismatch (tiled)"

    # --- Decode-shaped call with the F stripes split across cores (v7x path) ---
    x_c = jax.random.normal(k1, (1, 8, H2), dtype=jnp.float32)
    out_c = dbrx_expert_glu(x_c, w1bt, v1bt, w2bp, 0, tile_f=128,
                            num_core_splits=2)
    out_c = jax.block_until_ready(out_c)
    ref_c = reference_glu(x_c, w1b, v1b, w2b, 0)
    assert jnp.allclose(out_c, ref_c, atol=1e-3, rtol=1e-3), "mismatch (split)"

    print("KERNEL_OK")
</pallas_src>

<mosaic_0001>
module attributes {stable_mosaic.version = 11 : i64} {
  func.func @_kernel_acc_in_output(%arg0: i32, %arg1: i32, %arg2: i32, %arg3: memref<1xi32, #tpu.memory_space<smem>>, %arg4: memref<16x32xf32, #tpu.memory_space<vmem>>, %arg5: memref<1x32x64xf32, #tpu.memory_space<vmem>>, %arg6: memref<1x32x64xf32, #tpu.memory_space<vmem>>, %arg7: memref<1x64x32xf32, #tpu.memory_space<vmem>>, %arg8: memref<1x16x32xf32, #tpu.memory_space<vmem>>) attributes {dimension_semantics = [#tpu.dimension_semantics<parallel>, #tpu.dimension_semantics<parallel>, #tpu.dimension_semantics<arbitrary>], iteration_bounds = array<i64: 1, 1, 1>, scalar_prefetch = 1 : i64, scratch_operands = 0 : i64, tpu.core_type = #tpu.core_type<tc>, window_params = [{transform_indices = @transform_0, window_bounds = array<i64: 16, 32>}, {transform_indices = @transform_1, window_bounds = array<i64: 1, 32, 64>}, {transform_indices = @transform_2, window_bounds = array<i64: 1, 32, 64>}, {transform_indices = @transform_3, window_bounds = array<i64: 1, 64, 32>}, {transform_indices = @transform_4, window_bounds = array<i64: 1, 16, 32>}]} {
    %c0_i32 = arith.constant 0 : i32
    %0 = arith.cmpi eq, %arg2, %c0_i32 : i32
    %1 = arith.extui %0 : i1 to i32
    %c0_i32_0 = arith.constant 0 : i32
    %2 = arith.cmpi ne, %1, %c0_i32_0 : i32
    scf.if %2 {
      %cst_20 = arith.constant 0.000000e+00 : f32
      %24 = vector.broadcast %cst_20 : f32 to vector<1x16x32xf32>
      %c0_21 = arith.constant 0 : index
      %c0_22 = arith.constant 0 : index
      %c0_23 = arith.constant 0 : index
      %25 = vector.load %arg8[%c0_21, %c0_22, %c0_23] : memref<1x16x32xf32, #tpu.memory_space<vmem>>, vector<1x16x32xf32>
      tpu.vector_store %arg8[%c0_21, %c0_22, %c0_23], %24 {strides = array<i32>} : memref<1x16x32xf32, #tpu.memory_space<vmem>>, vector<1x16x32xf32>,
    } else {
    }
    %c0 = arith.constant 0 : index
    %c0_1 = arith.constant 0 : index
    %c0_2 = arith.constant 0 : index
    %3 = vector.load %arg8[%c0, %c0_1, %c0_2] : memref<1x16x32xf32, #tpu.memory_space<vmem>>, vector<1x16x32xf32>
    %c0_3 = arith.constant 0 : index
    %c0_4 = arith.constant 0 : index
    %4 = vector.load %arg4[%c0_3, %c0_4] : memref<16x32xf32, #tpu.memory_space<vmem>>, vector<16x32xf32>
    %c0_5 = arith.constant 0 : index
    %c0_6 = arith.constant 0 : index
    %c0_7 = arith.constant 0 : index
    %5 = vector.load %arg5[%c0_5, %c0_6, %c0_7] : memref<1x32x64xf32, #tpu.memory_space<vmem>>, vector<1x32x64xf32>
    %6 = vector.shape_cast %5 : vector<1x32x64xf32> to vector<32x64xf32>
    %c0_8 = arith.constant 0 : index
    %c0_9 = arith.constant 0 : index
    %c0_10 = arith.constant 0 : index
    %7 = vector.load %arg6[%c0_8, %c0_9, %c0_10] : memref<1x32x64xf32, #tpu.memory_space<vmem>>, vector<1x32x64xf32>
    %8 = vector.shape_cast %7 : vector<1x32x64xf32> to vector<32x64xf32>
    %c0_11 = arith.constant 0 : index
    %c0_12 = arith.constant 0 : index
    %c0_13 = arith.constant 0 : index
    %9 = vector.load %arg7[%c0_11, %c0_12, %c0_13] : memref<1x64x32xf32, #tpu.memory_space<vmem>>, vector<1x64x32xf32>
    %10 = vector.shape_cast %9 : vector<1x64x32xf32> to vector<64x32xf32>
    %cst = arith.constant dense<0.000000e+00> : vector<16x64xf32>
    %11 = tpu.matmul %4, %6, %cst {dimension_numbers = #tpu.dot_dimension_numbers<[1], [0], [0], [1], [0, 0, 1, 1], [], []>} : vector<16x32xf32>, vector<32x64xf32>, vector<16x64xf32> -> vector<16x64xf32>
    %cst_14 = arith.constant dense<0.000000e+00> : vector<16x64xf32>
    %12 = tpu.matmul %4, %8, %cst_14 {dimension_numbers = #tpu.dot_dimension_numbers<[1], [0], [0], [1], [0, 0, 1, 1], [], []>} : vector<16x32xf32>, vector<32x64xf32>, vector<16x64xf32> -> vector<16x64xf32>
    %13 = arith.negf %11 : vector<16x64xf32>
    %14 = math.exp %13 : vector<16x64xf32>
    %cst_15 = arith.constant 1.000000e+00 : f32
    %15 = vector.broadcast %cst_15 : f32 to vector<16x64xf32>
    %16 = arith.addf %15, %14 : vector<16x64xf32>
    %17 = arith.divf %15, %16 : vector<16x64xf32>
    %18 = arith.mulf %11, %17 : vector<16x64xf32>
    %19 = arith.mulf %18, %12 : vector<16x64xf32>
    %cst_16 = arith.constant dense<0.000000e+00> : vector<16x32xf32>
    %20 = tpu.matmul %19, %10, %cst_16 {dimension_numbers = #tpu.dot_dimension_numbers<[1], [0], [0], [1], [0, 0, 1, 1], [], []>} : vector<16x64xf32>, vector<64x32xf32>, vector<16x32xf32> -> vector<16x32xf32>
    %21 = vector.shape_cast %20 : vector<16x32xf32> to vector<1x16x32xf32>
    %22 = arith.addf %3, %21 : vector<1x16x32xf32>
    %c0_17 = arith.constant 0 : index
    %c0_18 = arith.constant 0 : index
    %c0_19 = arith.constant 0 : index
    %23 = vector.load %arg8[%c0_17, %c0_18, %c0_19] : memref<1x16x32xf32, #tpu.memory_space<vmem>>, vector<1x16x32xf32>
    tpu.vector_store %arg8[%c0_17, %c0_18, %c0_19], %22 {strides = array<i32>} : memref<1x16x32xf32, #tpu.memory_space<vmem>>, vector<1x16x32xf32>,
    return
  }
  func.func @transform_0(%arg0: i32, %arg1: i32, %arg2: i32, %arg3: memref<1xi32, #tpu.memory_space<smem>>) -> (i32, i32) {
    %c0_i32 = arith.constant 0 : i32
    %c0_i32_0 = arith.constant 0 : i32
    return %arg1, %c0_i32 : i32, i32
  }
  func.func @transform_1(%arg0: i32, %arg1: i32, %arg2: i32, %arg3: memref<1xi32, #tpu.memory_space<smem>>) -> (i32, i32, i32) {
    %c0 = arith.constant 0 : index
    %0 = memref.load %arg3[%c0] : memref<1xi32, #tpu.memory_space<smem>>
    %c1_i32 = arith.constant 1 : i32
    %1 = arith.muli %arg0, %c1_i32 : i32
    %2 = arith.addi %1, %arg2 : i32
    %c0_i32 = arith.constant 0 : i32
    %c0_i32_0 = arith.constant 0 : i32
    return %0, %c0_i32, %2 : i32, i32, i32
  }
  func.func @transform_2(%arg0: i32, %arg1: i32, %arg2: i32, %arg3: memref<1xi32, #tpu.memory_space<smem>>) -> (i32, i32, i32) {
    %c0 = arith.constant 0 : index
    %0 = memref.load %arg3[%c0] : memref<1xi32, #tpu.memory_space<smem>>
    %c1_i32 = arith.constant 1 : i32
    %1 = arith.muli %arg0, %c1_i32 : i32
    %2 = arith.addi %1, %arg2 : i32
    %c0_i32 = arith.constant 0 : i32
    %c0_i32_0 = arith.constant 0 : i32
    return %0, %c0_i32, %2 : i32, i32, i32
  }
  func.func @transform_3(%arg0: i32, %arg1: i32, %arg2: i32, %arg3: memref<1xi32, #tpu.memory_space<smem>>) -> (i32, i32, i32) {
    %c0 = arith.constant 0 : index
    %0 = memref.load %arg3[%c0] : memref<1xi32, #tpu.memory_space<smem>>
    %c1_i32 = arith.constant 1 : i32
    %1 = arith.muli %arg0, %c1_i32 : i32
    %2 = arith.addi %1, %arg2 : i32
    %c0_i32 = arith.constant 0 : i32
    %c0_i32_0 = arith.constant 0 : i32
    return %0, %2, %c0_i32 : i32, i32, i32
  }
  func.func @transform_4(%arg0: i32, %arg1: i32, %arg2: i32, %arg3: memref<1xi32, #tpu.memory_space<smem>>) -> (i32, i32, i32) {
    %c0_i32 = arith.constant 0 : i32
    %c0_i32_0 = arith.constant 0 : i32
    return %arg0, %arg1, %c0_i32 : i32, i32, i32
  }
}

</mosaic_0001>

<bundles_post_ra>
// kernel: dbrx_expert_glu.1
= control target key start
LH: loop header
LB: loop body
LE: loop exit
PB: predicated region body
PF: predicated region fallthrough
CT: control target
= control target key end

     0   :  { %vm131_vm0 = vcmask 261120   ;;  %s692_s0 = inlined_call_operand.<no memory space> [shape: s32[1], index: 0, kind: input, shape index: {}]   ;;  %s693_s1 = inlined_call_operand.vmem [shape: f32[16,32], index: 1, kind: input, shape index: {}]   ;;  %s694_s2 = inlined_call_operand.vmem [shape: f32[4,32,64], index: 2, kind: input, shape index: {}]   ;;  %s695_s3 = inlined_call_operand.vmem [shape: f32[4,32,64], index: 3, kind: input, shape index: {}]   ;;  %s696_s4 = inlined_call_operand.vmem [shape: f32[4,64,32], index: 4, kind: input, shape index: {}]   ;;  %s697_s5 = inlined_call_operand.hbm [shape: f32[1,16,32], index: 5, kind: output, shape index: {}]  }
   0x1   :  { %p91_p0 = scmp.lt.s32.totalorder %s692_s0, 3  ;;  %v136_v0 = vld [vmem:[%s693_s1] sm:$0xff] }
   0x2   :  { %11 = vsyncpa [#allocation5], 0  ;;  %512 = vmatprep.mubr.msk.f32.mxu1 %vm131_vm0, %v136_v0  ;;  %v137_v12 = vld [vmem:[%s693_s1 + $0x8] sm:$0xff]  ;;  %v613_v26 = vmov 0.0   ;;  %vm327_vm1 = vcmask 523264  }
   0x3   :  { %s699_s0 = smov (!%p91_p0, %s692_s0), 3  ;;  %133 = vst.msk [vmem:[#allocation4 + $0x8] sm:$0xff] %vm131_vm0, %v613_v26  ;;  %132 = vst.msk [vmem:[#allocation4] sm:$0xff] %vm131_vm0, %v613_v26 }
   0x4   :  { %s479_s24 = sshll.u32 %s699_s0, 5 }
   0x5   :  { %s98_s27 = scalar_lea.vmem %s694_s2, %s479_s24  ;;  %s110_s30 = scalar_lea.vmem %s695_s3, %s479_s24 }
   0x6   :  { %v138_v1 = vld [vmem:[%s98_s27] sm:$0xff]  ;;  %v139_v2 = vld [vmem:[%s98_s27 + $0x8] sm:$0xff]  ;;  %v140_v3 = vld [vmem:[%s98_s27 + $0x10] sm:$0xff]  ;;  %s481_s3 = sshll.u32 %s699_s0, 6  ;;  %s614_s0 = smov [#allocation4]  }
   0x7   :  { %v545_v4 = vpack.c.bf16 %v139_v2, %v138_v1  ;;  %v141_v5 = vld [vmem:[%s98_s27 + $0x18] sm:$0xff]  ;;  %v142_v7 = vld [vmem:[%s110_s30] sm:$0xff]  ;;  %v143_v8 = vld [vmem:[%s110_s30 + $0x8] sm:$0xff]  ;;  %s123_s9 = scalar_lea.vmem %s696_s4, %s481_s3  ;;  %s418_s1 = sshll.u32 %s614_s0, 4  ;;  %s419_s1 = int_to_ptr.vmem [resolvable:$true] %s418_s1 }
   0x8   :  { %v549_v6 = vpack.c.bf16 %v141_v5, %v140_v3  ;;  %v553_v9 = vpack.c.bf16 %v143_v8, %v142_v7  ;;  %v144_v10 = vld [vmem:[%s110_s30 + $0x10] sm:$0xff]  ;;  %v145_v11 = vld [vmem:[%s110_s30 + $0x18] sm:$0xff]  ;;  %v146_v14 = vld [vmem:[%s123_s9] sm:$0xff]  ;;  %s589_s4 = scalar_lea.vmem %s419_s1, 256  ;;  %p594_p2 = scmp.lt.s32.totalorder %s419_s1, %s419_s1 }
   0x9   :  { %546 = vmatprep.subr.bf16.mxu1 %v545_v4  ;;  %v557_v13 = vpack.c.bf16 %v145_v11, %v144_v10  ;;  %v147_v15 = vld [vmem:[%s123_s9 + $0x8] sm:$0xff]  ;;  %v148_v17 = vld [vmem:[%s123_s9 + $0x10] sm:$0xff]  ;;  %v149_v18 = vld [vmem:[%s123_s9 + $0x18] sm:$0xff]  ;;  %p590_p1 = scmp.ne.s32.totalorder %s419_s1, %s589_s4  ;;  %p595_p3 = scmp.lt.s32.totalorder %s589_s4, %s589_s4 }
   0xa   :  { %548 = vmatpush3.bf16.msra.mxu1 %v545_v4  ;;  %v561_v16 = vpack.c.bf16 %v147_v15, %v146_v14  ;;  %v565_v19 = vpack.c.bf16 %v149_v18, %v148_v17  ;;  %v150_v20 = vld [vmem:[%s123_s9 + $0x20] sm:$0xff]  ;;  %v151_v21 = vld [vmem:[%s123_s9 + $0x28] sm:$0xff]  ;;  %v152_v23 = vld [vmem:[%s123_s9 + $0x30] sm:$0xff] }
   0xb   :  { %550 = vmatprep.subr.bf16.mxu1 %v549_v6  ;;  %v569_v22 = vpack.c.bf16 %v151_v21, %v150_v20  ;;  %v153_v24 = vld [vmem:[%s123_s9 + $0x38] sm:$0xff]  ;;  %v135_v43 = vld [vmem:[#allocation4 + $0x8] sm:$0xff]  ;;  %v134_v44 = vld [vmem:[#allocation4] sm:$0xff]  ;;  %p596_p4 = por %p595_p3, %p594_p2 }
   0xc   :  { %562 = vmatprep.subr.bf16.mxu0 %v561_v16  ;;  %v573_v25 = vpack.c.bf16 %v153_v24, %v152_v23 }
   0xd   :  { %564 = vmatpush3.bf16.msra.mxu0 %v561_v16  ;;  %p597_p5 = pnand %p596_p4, %p590_p1 }
   0xe   :  { %552 = vmatpush3.bf16.msra.mxu1 %v549_v6  ;;  %566 = vmatprep.subr.bf16.mxu0 %v565_v19 }
   0xf   :  { %554 = vmatprep.subr.bf16.mxu1 %v553_v9 }
  0x11   :  { %513 = vmatmul.mubr.msk.f32.vlgmr.msra.gmra.mrb[0].mxu1 %vm131_vm0, %v137_v12  ;;  %568 = vmatpush3.bf16.msra.mxu0 %v565_v19 }
  0x12   :  { %556 = vmatpush3.bf16.msra.mxu1 %v553_v9  ;;  %523 = vmatprep.mubr.msk.f32.mxu1 %vm131_vm0, %v136_v0 }
  0x13   :  { %558 = vmatprep.subr.bf16.mxu1 %v557_v13  ;;  %570 = vmatprep.subr.bf16.mxu0 %v569_v22 }
  0x15   :  { %572 = vmatpush3.bf16.msra.mxu0 %v569_v22 }
  0x16   :  { %560 = vmatpush3.bf16.msra.mxu1 %v557_v13  ;;  %574 = vmatprep.subr.bf16.mxu0 %v573_v25 }
  0x19   :  { %524 = vmatmul.mubr.msk.f32.vlgmr.msra.gmra.mrb[2].mxu1 %vm131_vm0, %v137_v12  ;;  %576 = vmatpush3.bf16.msra.mxu0 %v573_v25 }
  0xe4   :  { %v514_v27 = vpop.f32.mrb[0].mxu1 }
  0xe5   :  { %v476_v28 = vmul.f32 -1.442695, %v514_v27  ;;  %v227_v29 = vpop.f32.mrb[1].mxu1 }
  0xe6   :  { %v475_v30 = vmul.f32 -1.442695, %v227_v29 }
  0xe7   :  { %581 = vpow2.f32 %v476_v28 }
  0xe8   :  { %583 = vpow2.f32 %v475_v30 }
  0xec   :  { %v525_v31 = vpop.f32.mrb[2].mxu1 }
  0xed   :  { %v302_v32 = vpop.f32.mrb[3].mxu1 }
  0xf1   :  { %v582_v33 = vpop.eup %581 }
  0xf2   :  { %v584_v34 = vpop.eup %583  ;;  %v318_v35 = vadd.f32 1.0, %v582_v33 }
  0xf3   :  { %v317_v36 = vadd.f32 1.0, %v584_v34 }
  0xf4   :  { %585 = vrcp.f32 %v318_v35 }
  0xf5   :  { %587 = vrcp.f32 %v317_v36 }
  0xfe   :  { %v586_v37 = vpop.eup %585 }
  0xff   :  { %v588_v38 = vpop.eup %587  ;;  %v324_v39 = vmul.f32 %v586_v37, %v514_v27 }
 0x100   :  { %v323_v40 = vmul.f32 %v588_v38, %v227_v29 }
 0x101   :  { %v326_v41 = vmul.f32 %v525_v31, %v324_v39 }
 0x102   :  { %v325_v42 = vmul.f32 %v323_v40, %v302_v32 }
 0x104   :  { %542 = vmatprep.mubr.msk.f32.mxu0 %vm327_vm1, %v325_v42 }
 0x105   :  { %543 = vmatmul.mubr.msk.f32.vlgmr.msra.gmra.mrb[0].mxu0 %vm327_vm1, %v326_v41 }
 0x1d8   :  { %v544_v45 = vpop.f32.mrb[0].mxu0 }
 0x1d9   :  { %v410_v46 = vadd.f32 %v544_v45, %v135_v43  ;;  %v400_v47 = vpop.f32.mrb[1].mxu0 }
 0x1da   :  { %v409_v48 = vadd.f32 %v400_v47, %v134_v44 }
 0x1db   :  { %412 = vst.msk [vmem:[#allocation4 + $0x8] sm:$0xff] %vm131_vm0, %v410_v46 }
 0x1dc   :  { %411 = vst.msk [vmem:[#allocation4] sm:$0xff] %vm131_vm0, %v409_v48 }
 0x1dd   :  { %600 = shalt.err (!%p597_p5)
}
 0x1de   :  { %s601_s12 = scalar_lea.hbm %s697_s5, 256 }
 0x1df   :  { %p602_p6 = scmp.ne.s32.totalorder %s697_s5, %s601_s12  ;;  %p605_p7 = scmp.lt.u32.totalorder %s601_s12, %s697_s5 }
 0x1e1   :  { %p607_p8 = pnand %p605_p7, %p602_p6 }
 0x1e3   :  { %610 = shalt.err (!%p607_p8)
}
 0x1e4   :  { %s615_s17 = smov 128   ;;  %s616_s18 = smov 8  }
 0x1e5   :  { %424 = dma.vmem_to_hbm [thread:$0]  %s419_s1, 256, %s697_s5, [#allocation5], %s615_s17, %s615_s17, %s616_s18  }
 0x1e6   :  { %611 = dma.done.wait [#allocation5], 256  }
 0x1e7   :  { %612 = vsyncadd [#allocation5], 4294967040 }
 0x1e8   :  { %428 = vsyncpa [#allocation5], 1 }

</bundles_post_ra>
